<compile_context>
chip_gen: v7x
topology: tpu7x:2x2x1
jax: 0.10.0
libtpu: 0.0.40
codegen_flags: <defaults>
</compile_context>

<pallas_src>
import functools

import jax
import jax.numpy as jnp
from jax.experimental import pallas as pl
from jax.experimental.pallas import tpu as pltpu


def _round_up(n, m):
    return ((n + m - 1) // m) * m


def _cdiv(a, b):
    return (a + b - 1) // b


def vae_kernel(xe_ref,
               w1_ref, b1_ref, w2_ref, b2_ref,
               w3_ref, b3_ref, w4_ref, b4_ref, w5_ref, b5_ref,
               recon_ref, stats_ref):
    f32 = jnp.float32
    cdt = w1_ref.dtype                       # compute (weight/activation) dtype
    rows = xe_ref.shape[0]
    input_dim = w1_ref.shape[0]
    latent_dim = w3_ref.shape[0]
    inter_dim = w3_ref.shape[1]

    # Input slab is [x | eps]; both slices start inside one lane tile.
    x = xe_ref[:, :input_dim]
    eps = xe_ref[:, input_dim:].astype(f32)

    # ---- encoder: Linear(input -> inter) -> ReLU ---------------------------
    h = jnp.dot(x, w1_ref[...], preferred_element_type=f32)
    h = jnp.maximum(h + b1_ref[...].astype(f32), 0.0).astype(cdt)

    # ---- encoder head: single fused Linear(inter -> 2*latent) --------------
    # One MXU weight fill; mu/logvar are lane slices of an 8-wide result.
    enc = (jnp.dot(h, w2_ref[...], preferred_element_type=f32)
           + b2_ref[...].astype(f32))
    mu = enc[:, :latent_dim]
    logvar = enc[:, latent_dim:]

    # ---- reparameterise (f32: exp on EUP, elementwise on VPU) --------------
    z = mu + eps * jnp.exp(logvar * 0.5)

    # ---- decoder Linear(latent -> inter) ------------------------------------
    # Tiny-K contraction: VPU broadcast-FMAs only while the (rows, inter)
    # f32 accumulator stays small (<= ~16 vregs); otherwise use the MXU so we
    # don't stream a huge accumulator through VMEM latent_dim times.
    if latent_dim <= 8 and rows * inter_dim <= 16 * 1024:
        w3 = w3_ref[...].astype(f32)
        d = jnp.broadcast_to(b3_ref[...].astype(f32), (rows, inter_dim))
        for k in range(latent_dim):                     # static, unrolled
            d = d + z[:, k:k + 1] * w3[k:k + 1, :]
    else:
        d = (jnp.dot(z.astype(cdt), w3_ref[...], preferred_element_type=f32)
             + b3_ref[...].astype(f32))
    d = jnp.maximum(d, 0.0).astype(cdt)

    # ---- decoder: Linear -> ReLU -> Linear ----------------------------------
    d = jnp.dot(d, w4_ref[...], preferred_element_type=f32) + b4_ref[...].astype(f32)
    d = jnp.maximum(d, 0.0).astype(cdt)
    recon = jnp.dot(d, w5_ref[...], preferred_element_type=f32) + b5_ref[...].astype(f32)

    # ---- two lane-0-aligned output slabs ------------------------------------
    recon_ref[...] = recon.astype(recon_ref.dtype)
    # stats = [mu | logvar | z]; enc already is [mu | logvar] so only z is
    # appended (no split/re-pack shuffles, no zeros padding piece).
    stats_ref[...] = jnp.concatenate([enc, z], axis=-1).astype(stats_ref.dtype)


def vae_forward(x, eps, params, *, tm=256, min_grid_steps=4):
    """VAE forward. Returns (recon, mu, logvar, z) like the PyTorch module."""
    raw_shape = x.shape
    input_dim = raw_shape[-1]
    x2 = x.reshape(-1, input_dim)
    n_rows = x2.shape[0]
    latent_dim = params["w3"].shape[0]
    inter_dim = params["w3"].shape[1]

    cdt = params["w1"].dtype                  # compute dtype (f32 or bf16)
    itemsize = jnp.dtype(cdt).itemsize

    cast = lambda a: a.astype(cdt)
    w1, b1 = cast(params["w1"]), cast(params["b1"])
    w2, b2 = cast(params["w2"]), cast(params["b2"])       # fused mu|logvar head
    w3, b3 = cast(params["w3"]), cast(params["b3"])
    w4, b4 = cast(params["w4"]), cast(params["b4"])
    w5, b5 = cast(params["w5"]), cast(params["b5"])
    weights = [w1, b1, w2, b2, w3, b3, w4, b4, w5, b5]

    # ---- row tiling ----------------------------------------------------------
    # Big tiles (default 256, MXU-aligned) for throughput, but never collapse
    # to a single grid step when rows allow: >= min_grid_steps steps gives
    # megacore splitting on v7x (2 TCs) plus DMA/compute overlap everywhere.
    row_align = 16 if itemsize == 2 else 8
    cand = _round_up(max(_cdiv(n_rows, min_grid_steps), row_align), row_align)
    tm_eff = min(_round_up(tm, row_align), cand)
    n_pad = _round_up(n_rows, tm_eff)

    # Input slab [x | eps]: one pipelined stream instead of two; rows padded
    # so ragged batches work (pad rows sliced off after the kernel).
    xe = jnp.concatenate([x2.astype(cdt), eps.astype(cdt)], axis=-1)
    xe = jnp.pad(xe, ((0, n_pad - n_rows), (0, 0)))
    xe_width = input_dim + latent_dim

    grid = (n_pad // tm_eff,)

    # ---- VMEM budgeting ------------------------------------------------------
    # Weights use whole-array constant-index blocks (fetched once). Past a few
    # MiB, single-buffer them (their block index never changes, so double
    # buffering is pure waste) and size the scoped-VMEM limit explicitly so
    # scaled-up inter_dim still fits v7x's 64 MiB / v5e's 16 MiB default.
    weight_bytes = sum(int(a.size) * a.dtype.itemsize for a in weights)
    single_buffer_weights = weight_bytes > (4 << 20)
    wbuf = 1 if single_buffer_weights else 2
    io_bytes = 2 * tm_eff * (xe_width * itemsize            # input slab
                             + input_dim * itemsize         # recon slab
                             + 3 * latent_dim * 4)          # stats slab (f32)
    scratch_headroom = 8 * tm_eff * inter_dim * 4            # live f32 temporaries
    vmem_est = wbuf * weight_bytes + io_bytes + scratch_headroom
    vmem_limit = None
    if vmem_est > (12 << 20):
        vmem_limit = int(min(96 << 20, max(2 * vmem_est, 32 << 20)))

    def const_spec(arr):
        kwargs = {}
        if single_buffer_weights:
            kwargs["pipeline_mode"] = pl.Buffered(1)
        return pl.BlockSpec(arr.shape, lambda i: (0,) * arr.ndim, **kwargs)

    in_specs = [pl.BlockSpec((tm_eff, xe_width), lambda i: (i, 0))]
    in_specs += [const_spec(a) for a in weights]

    out_specs = (
        pl.BlockSpec((tm_eff, input_dim), lambda i: (i, 0)),         # recon
        pl.BlockSpec((tm_eff, 3 * latent_dim), lambda i: (i, 0)),    # mu|logvar|z
    )
    out_shape = (
        jax.ShapeDtypeStruct((n_pad, input_dim), cdt),
        jax.ShapeDtypeStruct((n_pad, 3 * latent_dim), jnp.float32),
    )

    recon_p, stats = pl.pallas_call(
        vae_kernel,
        grid=grid,
        in_specs=in_specs,
        out_specs=out_specs,
        out_shape=out_shape,
        compiler_params=pltpu.CompilerParams(
            # Rows are independent: "parallel" lets the row grid be split
            # across both TensorCores on v7x.
            dimension_semantics=("parallel",),
            vmem_limit_bytes=vmem_limit),
    )(xe, *weights)

    recon = recon_p[:n_rows, :].reshape(raw_shape)
    mu = stats[:n_rows, :latent_dim]
    logvar = stats[:n_rows, latent_dim:2 * latent_dim]
    z = stats[:n_rows, 2 * latent_dim:]
    return recon, mu, logvar, z


def vae_reference(x, eps, p):
    """Plain-JAX reference mirroring the PyTorch forward."""
    raw_shape = x.shape
    latent_dim = p["w3"].shape[0]
    x2 = x.reshape(-1, raw_shape[-1])
    h = jnp.maximum(x2 @ p["w1"] + p["b1"], 0.0)
    h = h @ p["w2"] + p["b2"]
    mu, logvar = h[:, :latent_dim], h[:, latent_dim:]
    z = mu + eps * jnp.exp(logvar / 2.0)
    d = jnp.maximum(z @ p["w3"] + p["b3"], 0.0)
    d = jnp.maximum(d @ p["w4"] + p["b4"], 0.0)
    recon = (d @ p["w5"] + p["b5"]).reshape(raw_shape)
    return recon, mu, logvar, z


def init_params(key, input_dim, inter_dim, latent_dim, dtype=jnp.float32):
    """Deterministic init; weights stored as (in, out), biases as (1, out)."""
    def linear(k, fan_in, fan_out):
        kw, kb = jax.random.split(k)
        bound = 1.0 / jnp.sqrt(fan_in)
        w = jax.random.uniform(kw, (fan_in, fan_out), dtype, -bound, bound)
        b = jax.random.uniform(kb, (1, fan_out), dtype, -bound, bound)
        return w, b

    k1, k2, k3, k4, k5 = jax.random.split(key, 5)
    w1, b1 = linear(k1, input_dim, inter_dim)          # encoder Linear 0
    w2, b2 = linear(k2, inter_dim, latent_dim * 2)     # encoder Linear 2
    w3, b3 = linear(k3, latent_dim, inter_dim)         # decoder Linear 0
    w4, b4 = linear(k4, inter_dim, inter_dim)          # decoder Linear 2
    w5, b5 = linear(k5, inter_dim, input_dim)          # decoder Linear 4
    return dict(w1=w1, b1=b1, w2=w2, b2=b2, w3=w3, b3=b3,
                w4=w4, b4=b4, w5=w5, b5=b5)


if __name__ == "__main__":
    INPUT_DIM = 32
    INTER_DIM = 256
    LATENT_DIM = 4
    BATCH, SEQ = 2, 8          # x: (2, 8, 32) -> flattened rows N = 16

    root = jax.random.PRNGKey(0)
    k_params, k_x, k_eps = jax.random.split(root, 3)

    params = init_params(k_params, INPUT_DIM, INTER_DIM, LATENT_DIM)
    x = jax.random.normal(k_x, (BATCH, SEQ, INPUT_DIM), jnp.float32)
    # epsilon for the reparameterisation (torch.randn_like equivalent), drawn
    # outside the kernel so the kernel stays deterministic.
    eps = jax.random.normal(k_eps, (BATCH * SEQ, LATENT_DIM), jnp.float32)

    fwd = jax.jit(functools.partial(vae_forward, tm=256))

    # ---- f32 run: tight tolerance vs plain-JAX reference --------------------
    recon, mu, logvar, z = jax.block_until_ready(fwd(x, eps, params))
    r_recon, r_mu, r_logvar, r_z = vae_reference(x, eps, params)
    assert recon.shape == x.shape
    assert mu.shape == (BATCH * SEQ, LATENT_DIM)
    assert jnp.allclose(recon, r_recon, atol=1e-5, rtol=1e-5)
    assert jnp.allclose(mu, r_mu, atol=1e-5, rtol=1e-5)
    assert jnp.allclose(logvar, r_logvar, atol=1e-5, rtol=1e-5)
    assert jnp.allclose(z, r_z, atol=1e-5, rtol=1e-5)

    # ---- bf16 weight/activation run (MXU win on v5e/v6e/v7x alike): f32 acc --
    params_bf16 = jax.tree_util.tree_map(lambda a: a.astype(jnp.bfloat16), params)
    recon_b, mu_b, logvar_b, z_b = jax.block_until_ready(fwd(x, eps, params_bf16))
    assert recon_b.shape == x.shape
    assert jnp.allclose(recon_b.astype(jnp.float32), r_recon, atol=1e-1, rtol=1e-1)
    assert jnp.allclose(mu_b, r_mu, atol=1e-1, rtol=1e-1)
    assert jnp.allclose(z_b, r_z, atol=1e-1, rtol=1e-1)

    print("KERNEL_OK")
</pallas_src>

<mosaic_0001>
module attributes {stable_mosaic.version = 11 : i64} {
  func.func @vae_kernel(%arg0: i32, %arg1: memref<8x36xf32, #tpu.memory_space<vmem>>, %arg2: memref<32x256xf32, #tpu.memory_space<vmem>>, %arg3: memref<1x256xf32, #tpu.memory_space<vmem>>, %arg4: memref<256x8xf32, #tpu.memory_space<vmem>>, %arg5: memref<1x8xf32, #tpu.memory_space<vmem>>, %arg6: memref<4x256xf32, #tpu.memory_space<vmem>>, %arg7: memref<1x256xf32, #tpu.memory_space<vmem>>, %arg8: memref<256x256xf32, #tpu.memory_space<vmem>>, %arg9: memref<1x256xf32, #tpu.memory_space<vmem>>, %arg10: memref<256x32xf32, #tpu.memory_space<vmem>>, %arg11: memref<1x32xf32, #tpu.memory_space<vmem>>, %arg12: memref<8x32xf32, #tpu.memory_space<vmem>>, %arg13: memref<8x12xf32, #tpu.memory_space<vmem>>) attributes {dimension_semantics = [#tpu.dimension_semantics<parallel>], iteration_bounds = array<i64: 2>, scalar_prefetch = 0 : i64, scratch_operands = 0 : i64, tpu.core_type = #tpu.core_type<tc>, window_params = [{transform_indices = @transform_0, window_bounds = array<i64: 8, 36>}, {pipeline_mode = #tpu.pipeline_mode<synchronous>, transform_indices = @transform_1, window_bounds = array<i64: 32, 256>}, {pipeline_mode = #tpu.pipeline_mode<synchronous>, transform_indices = @transform_2, window_bounds = array<i64: 1, 256>}, {pipeline_mode = #tpu.pipeline_mode<synchronous>, transform_indices = @transform_3, window_bounds = array<i64: 256, 8>}, {pipeline_mode = #tpu.pipeline_mode<synchronous>, transform_indices = @transform_4, window_bounds = array<i64: 1, 8>}, {pipeline_mode = #tpu.pipeline_mode<synchronous>, transform_indices = @transform_5, window_bounds = array<i64: 4, 256>}, {pipeline_mode = #tpu.pipeline_mode<synchronous>, transform_indices = @transform_6, window_bounds = array<i64: 1, 256>}, {pipeline_mode = #tpu.pipeline_mode<synchronous>, transform_indices = @transform_7, window_bounds = array<i64: 256, 256>}, {pipeline_mode = #tpu.pipeline_mode<synchronous>, transform_indices = @transform_8, window_bounds = array<i64: 1, 256>}, {pipeline_mode = #tpu.pipeline_mode<synchronous>, transform_indices = @transform_9, window_bounds = array<i64: 256, 32>}, {pipeline_mode = #tpu.pipeline_mode<synchronous>, transform_indices = @transform_10, window_bounds = array<i64: 1, 32>}, {transform_indices = @transform_11, window_bounds = array<i64: 8, 32>}, {transform_indices = @transform_12, window_bounds = array<i64: 8, 12>}]} {
    %c0 = arith.constant 0 : index
    %c0_0 = arith.constant 0 : index
    %0 = vector.load %arg1[%c0, %c0_0] : memref<8x36xf32, #tpu.memory_space<vmem>>, vector<8x32xf32>
    %c0_1 = arith.constant 0 : index
    %c32 = arith.constant 32 : index
    %1 = vector.load %arg1[%c0_1, %c32] : memref<8x36xf32, #tpu.memory_space<vmem>>, vector<8x4xf32>
    %c0_2 = arith.constant 0 : index
    %c0_3 = arith.constant 0 : index
    %2 = vector.load %arg2[%c0_2, %c0_3] : memref<32x256xf32, #tpu.memory_space<vmem>>, vector<32x256xf32>
    %cst = arith.constant dense<0.000000e+00> : vector<8x256xf32>
    %3 = tpu.matmul %0, %2, %cst {dimension_numbers = #tpu.dot_dimension_numbers<[1], [0], [0], [1], [0, 0, 1, 1], [], []>} : vector<8x32xf32>, vector<32x256xf32>, vector<8x256xf32> -> vector<8x256xf32>
    %c0_4 = arith.constant 0 : index
    %c0_5 = arith.constant 0 : index
    %4 = vector.load %arg3[%c0_4, %c0_5] : memref<1x256xf32, #tpu.memory_space<vmem>>, vector<1x256xf32>
    %5 = vector.broadcast %4 : vector<1x256xf32> to vector<8x256xf32>
    %6 = arith.addf %3, %5 : vector<8x256xf32>
    %cst_6 = arith.constant 0.000000e+00 : f32
    %7 = vector.broadcast %cst_6 : f32 to vector<8x256xf32>
    %8 = arith.maximumf %6, %7 : vector<8x256xf32>
    %c0_7 = arith.constant 0 : index
    %c0_8 = arith.constant 0 : index
    %9 = vector.load %arg4[%c0_7, %c0_8] : memref<256x8xf32, #tpu.memory_space<vmem>>, vector<256x8xf32>
    %cst_9 = arith.constant dense<0.000000e+00> : vector<8x8xf32>
    %10 = tpu.matmul %8, %9, %cst_9 {dimension_numbers = #tpu.dot_dimension_numbers<[1], [0], [0], [1], [0, 0, 1, 1], [], []>} : vector<8x256xf32>, vector<256x8xf32>, vector<8x8xf32> -> vector<8x8xf32>
    %c0_10 = arith.constant 0 : index
    %c0_11 = arith.constant 0 : index
    %11 = vector.load %arg5[%c0_10, %c0_11] : memref<1x8xf32, #tpu.memory_space<vmem>>, vector<1x8xf32>
    %12 = vector.broadcast %11 : vector<1x8xf32> to vector<8x8xf32>
    %13 = arith.addf %10, %12 : vector<8x8xf32>
    %14 = vector.extract_strided_slice %13 {offsets = [0, 0], sizes = [8, 4], strides = [1, 1]} : vector<8x8xf32> to vector<8x4xf32>
    %15 = vector.extract_strided_slice %13 {offsets = [0, 4], sizes = [8, 4], strides = [1, 1]} : vector<8x8xf32> to vector<8x4xf32>
    %cst_12 = arith.constant 5.000000e-01 : f32
    %16 = vector.broadcast %cst_12 : f32 to vector<8x4xf32>
    %17 = arith.mulf %15, %16 : vector<8x4xf32>
    %18 = math.exp %17 : vector<8x4xf32>
    %19 = arith.mulf %1, %18 : vector<8x4xf32>
    %20 = arith.addf %14, %19 : vector<8x4xf32>
    %c0_13 = arith.constant 0 : index
    %c0_14 = arith.constant 0 : index
    %21 = vector.load %arg6[%c0_13, %c0_14] : memref<4x256xf32, #tpu.memory_space<vmem>>, vector<4x256xf32>
    %c0_15 = arith.constant 0 : index
    %c0_16 = arith.constant 0 : index
    %22 = vector.load %arg7[%c0_15, %c0_16] : memref<1x256xf32, #tpu.memory_space<vmem>>, vector<1x256xf32>
    %23 = vector.shape_cast %22 : vector<1x256xf32> to vector<1x256xf32>
    %24 = vector.broadcast %23 : vector<1x256xf32> to vector<8x256xf32>
    %25 = vector.extract_strided_slice %20 {offsets = [0, 0], sizes = [8, 1], strides = [1, 1]} : vector<8x4xf32> to vector<8x1xf32>
    %26 = vector.extract_strided_slice %21 {offsets = [0, 0], sizes = [1, 256], strides = [1, 1]} : vector<4x256xf32> to vector<1x256xf32>
    %27 = vector.broadcast %25 : vector<8x1xf32> to vector<8x256xf32>
    %28 = vector.broadcast %26 : vector<1x256xf32> to vector<8x256xf32>
    %29 = arith.mulf %27, %28 : vector<8x256xf32>
    %30 = arith.addf %24, %29 : vector<8x256xf32>
    %31 = vector.extract_strided_slice %20 {offsets = [0, 1], sizes = [8, 1], strides = [1, 1]} : vector<8x4xf32> to vector<8x1xf32>
    %32 = vector.extract_strided_slice %21 {offsets = [1, 0], sizes = [1, 256], strides = [1, 1]} : vector<4x256xf32> to vector<1x256xf32>
    %33 = vector.broadcast %31 : vector<8x1xf32> to vector<8x256xf32>
    %34 = vector.broadcast %32 : vector<1x256xf32> to vector<8x256xf32>
    %35 = arith.mulf %33, %34 : vector<8x256xf32>
    %36 = arith.addf %30, %35 : vector<8x256xf32>
    %37 = vector.extract_strided_slice %20 {offsets = [0, 2], sizes = [8, 1], strides = [1, 1]} : vector<8x4xf32> to vector<8x1xf32>
    %38 = vector.extract_strided_slice %21 {offsets = [2, 0], sizes = [1, 256], strides = [1, 1]} : vector<4x256xf32> to vector<1x256xf32>
    %39 = vector.broadcast %37 : vector<8x1xf32> to vector<8x256xf32>
    %40 = vector.broadcast %38 : vector<1x256xf32> to vector<8x256xf32>
    %41 = arith.mulf %39, %40 : vector<8x256xf32>
    %42 = arith.addf %36, %41 : vector<8x256xf32>
    %43 = vector.extract_strided_slice %20 {offsets = [0, 3], sizes = [8, 1], strides = [1, 1]} : vector<8x4xf32> to vector<8x1xf32>
    %44 = vector.extract_strided_slice %21 {offsets = [3, 0], sizes = [1, 256], strides = [1, 1]} : vector<4x256xf32> to vector<1x256xf32>
    %45 = vector.broadcast %43 : vector<8x1xf32> to vector<8x256xf32>
    %46 = vector.broadcast %44 : vector<1x256xf32> to vector<8x256xf32>
    %47 = arith.mulf %45, %46 : vector<8x256xf32>
    %48 = arith.addf %42, %47 : vector<8x256xf32>
    %cst_17 = arith.constant 0.000000e+00 : f32
    %49 = vector.broadcast %cst_17 : f32 to vector<8x256xf32>
    %50 = arith.maximumf %48, %49 : vector<8x256xf32>
    %c0_18 = arith.constant 0 : index
    %c0_19 = arith.constant 0 : index
    %51 = vector.load %arg8[%c0_18, %c0_19] : memref<256x256xf32, #tpu.memory_space<vmem>>, vector<256x256xf32>
    %cst_20 = arith.constant dense<0.000000e+00> : vector<8x256xf32>
    %52 = tpu.matmul %50, %51, %cst_20 {dimension_numbers = #tpu.dot_dimension_numbers<[1], [0], [0], [1], [0, 0, 1, 1], [], []>} : vector<8x256xf32>, vector<256x256xf32>, vector<8x256xf32> -> vector<8x256xf32>
    %c0_21 = arith.constant 0 : index
    %c0_22 = arith.constant 0 : index
    %53 = vector.load %arg9[%c0_21, %c0_22] : memref<1x256xf32, #tpu.memory_space<vmem>>, vector<1x256xf32>
    %54 = vector.broadcast %53 : vector<1x256xf32> to vector<8x256xf32>
    %55 = arith.addf %52, %54 : vector<8x256xf32>
    %cst_23 = arith.constant 0.000000e+00 : f32
    %56 = vector.broadcast %cst_23 : f32 to vector<8x256xf32>
    %57 = arith.maximumf %55, %56 : vector<8x256xf32>
    %c0_24 = arith.constant 0 : index
    %c0_25 = arith.constant 0 : index
    %58 = vector.load %arg10[%c0_24, %c0_25] : memref<256x32xf32, #tpu.memory_space<vmem>>, vector<256x32xf32>
    %cst_26 = arith.constant dense<0.000000e+00> : vector<8x32xf32>
    %59 = tpu.matmul %57, %58, %cst_26 {dimension_numbers = #tpu.dot_dimension_numbers<[1], [0], [0], [1], [0, 0, 1, 1], [], []>} : vector<8x256xf32>, vector<256x32xf32>, vector<8x32xf32> -> vector<8x32xf32>
    %c0_27 = arith.constant 0 : index
    %c0_28 = arith.constant 0 : index
    %60 = vector.load %arg11[%c0_27, %c0_28] : memref<1x32xf32, #tpu.memory_space<vmem>>, vector<1x32xf32>
    %61 = vector.broadcast %60 : vector<1x32xf32> to vector<8x32xf32>
    %62 = arith.addf %59, %61 : vector<8x32xf32>
    %c0_29 = arith.constant 0 : index
    %c0_30 = arith.constant 0 : index
    %63 = vector.load %arg12[%c0_29, %c0_30] : memref<8x32xf32, #tpu.memory_space<vmem>>, vector<8x32xf32>
    tpu.vector_store %arg12[%c0_29, %c0_30], %62 {strides = array<i32>} : memref<8x32xf32, #tpu.memory_space<vmem>>, vector<8x32xf32>,
    %64 = tpu.concatenate %13, %20 in 1 : vector<8x8xf32>, vector<8x4xf32> -> vector<8x12xf32>
    %c0_31 = arith.constant 0 : index
    %c0_32 = arith.constant 0 : index
    %65 = vector.load %arg13[%c0_31, %c0_32] : memref<8x12xf32, #tpu.memory_space<vmem>>, vector<8x12xf32>
    tpu.vector_store %arg13[%c0_31, %c0_32], %64 {strides = array<i32>} : memref<8x12xf32, #tpu.memory_space<vmem>>, vector<8x12xf32>,
    return
  }
  func.func @transform_0(%arg0: i32) -> (i32, i32) {
    %c0_i32 = arith.constant 0 : i32
    %c0_i32_0 = arith.constant 0 : i32
    return %arg0, %c0_i32 : i32, i32
  }
  func.func @transform_1(%arg0: i32) -> (i32, i32) {
    %c0_i32 = arith.constant 0 : i32
    %c0_i32_0 = arith.constant 0 : i32
    %c0_i32_1 = arith.constant 0 : i32
    return %c0_i32, %c0_i32_0 : i32, i32
  }
  func.func @transform_2(%arg0: i32) -> (i32, i32) {
    %c0_i32 = arith.constant 0 : i32
    %c0_i32_0 = arith.constant 0 : i32
    %c0_i32_1 = arith.constant 0 : i32
    return %c0_i32, %c0_i32_0 : i32, i32
  }
  func.func @transform_3(%arg0: i32) -> (i32, i32) {
    %c0_i32 = arith.constant 0 : i32
    %c0_i32_0 = arith.constant 0 : i32
    %c0_i32_1 = arith.constant 0 : i32
    return %c0_i32, %c0_i32_0 : i32, i32
  }
  func.func @transform_4(%arg0: i32) -> (i32, i32) {
    %c0_i32 = arith.constant 0 : i32
    %c0_i32_0 = arith.constant 0 : i32
    %c0_i32_1 = arith.constant 0 : i32
    return %c0_i32, %c0_i32_0 : i32, i32
  }
  func.func @transform_5(%arg0: i32) -> (i32, i32) {
    %c0_i32 = arith.constant 0 : i32
    %c0_i32_0 = arith.constant 0 : i32
    %c0_i32_1 = arith.constant 0 : i32
    return %c0_i32, %c0_i32_0 : i32, i32
  }
  func.func @transform_6(%arg0: i32) -> (i32, i32) {
    %c0_i32 = arith.constant 0 : i32
    %c0_i32_0 = arith.constant 0 : i32
    %c0_i32_1 = arith.constant 0 : i32
    return %c0_i32, %c0_i32_0 : i32, i32
  }
  func.func @transform_7(%arg0: i32) -> (i32, i32) {
    %c0_i32 = arith.constant 0 : i32
    %c0_i32_0 = arith.constant 0 : i32
    %c0_i32_1 = arith.constant 0 : i32
    return %c0_i32, %c0_i32_0 : i32, i32
  }
  func.func @transform_8(%arg0: i32) -> (i32, i32) {
    %c0_i32 = arith.constant 0 : i32
    %c0_i32_0 = arith.constant 0 : i32
    %c0_i32_1 = arith.constant 0 : i32
    return %c0_i32, %c0_i32_0 : i32, i32
  }
  func.func @transform_9(%arg0: i32) -> (i32, i32) {
    %c0_i32 = arith.constant 0 : i32
    %c0_i32_0 = arith.constant 0 : i32
    %c0_i32_1 = arith.constant 0 : i32
    return %c0_i32, %c0_i32_0 : i32, i32
  }
  func.func @transform_10(%arg0: i32) -> (i32, i32) {
    %c0_i32 = arith.constant 0 : i32
    %c0_i32_0 = arith.constant 0 : i32
    %c0_i32_1 = arith.constant 0 : i32
    return %c0_i32, %c0_i32_0 : i32, i32
  }
  func.func @transform_11(%arg0: i32) -> (i32, i32) {
    %c0_i32 = arith.constant 0 : i32
    %c0_i32_0 = arith.constant 0 : i32
    return %arg0, %c0_i32 : i32, i32
  }
  func.func @transform_12(%arg0: i32) -> (i32, i32) {
    %c0_i32 = arith.constant 0 : i32
    %c0_i32_0 = arith.constant 0 : i32
    return %arg0, %c0_i32 : i32, i32
  }
}

</mosaic_0001>

<bundles_post_ra>
// kernel: vae_forward.1
= control target key start
LH: loop header
LB: loop body
LE: loop exit
PB: predicated region body
PF: predicated region fallthrough
CT: control target
= control target key end

     0   :  { %s2116_s0 = inlined_call_operand.vmem [shape: f32[16,36], index: 0, kind: input, shape index: {}]   ;;  %s2117_s1 = inlined_call_operand.vmem [shape: f32[32,256], index: 1, kind: input, shape index: {}]   ;;  %s2118_s2 = inlined_call_operand.vmem [shape: f32[1,256], index: 2, kind: input, shape index: {}]   ;;  %s2119_s3 = inlined_call_operand.vmem [shape: f32[256,8], index: 3, kind: input, shape index: {}]   ;;  %s2120_s4 = inlined_call_operand.vmem [shape: f32[1,8], index: 4, kind: input, shape index: {}]   ;;  %s2121_s5 = inlined_call_operand.vmem [shape: f32[4,256], index: 5, kind: input, shape index: {}]   ;;  %s2122_s6 = inlined_call_operand.vmem [shape: f32[1,256], index: 6, kind: input, shape index: {}]   ;;  %s2123_s7 = inlined_call_operand.vmem [shape: f32[256,256], index: 7, kind: input, shape index: {}]   ;;  %s2124_s8 = inlined_call_operand.vmem [shape: f32[1,256], index: 8, kind: input, shape index: {}]   ;;  %s2125_s9 = inlined_call_operand.vmem [shape: f32[256,32], index: 9, kind: input, shape index: {}]   ;;  %s2126_s10 = inlined_call_operand.vmem [shape: f32[1,32], index: 10, kind: input, shape index: {}]   ;;  %s2127_s11 = inlined_call_operand.hbm [shape: f32[16,32], index: 11, kind: output, shape index: {0}]   ;;  %s2128_s12 = inlined_call_operand.vmem [shape: f32[16,12], index: 12, kind: output, shape index: {1}]  }
   0x1   :  { %2132 = sst [smem:[#allocation8_spill]] %s2117_s1 }
   0x2   :  { %18 = vsyncpa [#allocation3], 0 }
   0x3   :  { %20 = vsyncpa [#allocation3 + $0x1], 0  ;;  %s1543_s21 = smov 0   ;;  %s1545_s22 = smov 0  }
   0x4   :  { %s1547_s23 = smov 0   ;;  %s1549_s24 = smov 0  }
   0x5 LB: > { %2133 = sst [smem:[#allocation5_spill]] %s1463_s23  ;;  %s1564_s25 = sadd.s32 4294967295, %s1467_s24   ;;  %s1467_s24 = sphi %s1549_s24, %s2139_s24   ;;  %s1463_s23 = sphi %s1547_s23, %s2141_s23   ;;  %s1459_s22 = sphi %s1545_s22, %s2143_s22   ;;  %s1455_s21 = sphi %s1543_s21, %s2142_s21  }
   0x6   : > { %s1131_s26 = sadd.s32 4294967294, %s1467_s24   ;;  %s1568_s27 = sadd.s32 1, %s1467_s24  }
   0x7   : > { %2134 = sst [smem:[#allocation6_spill]] %s1568_s27  ;;  %s269_s28 = sadd.s32 1, %s1463_s23 }
   0x8   : > { %s266_s29 = ssub.s32 %s1467_s24, %s1568_s27  ;;  %p279_p0 = scmp.ne.s32.totalorder %s1463_s23, %s1459_s22 }
   0x9   : > { %p267_p1 = scmp.eq.s32.totalorder %s266_s29, 0  ;;  %p280_p2 = scmp.eq.s32.totalorder %s1564_s25, 1 }
   0xa   : > { %p285_p3 = scmp.ne.s32.totalorder %s1459_s22, %s1455_s21  ;;  %p286_p4 = scmp.eq.s32.totalorder %s1131_s26, 1 }
   0xb   : > { %s1579_s30 = scalar_select %p267_p1, %s1463_s23, %s269_s28  }
   0xc   : > { %p1581_p5 = por %p280_p2, %p279_p0  ;;  %p1585_p6 = por %p286_p4, %p285_p3 }
   0xd   : > { %2135 = sst [smem:[#allocation7_spill]] %s1579_s30  ;;  %p1134_p7 = scmp.ge.s32.totalorder %s1467_s24, 1 }
   0xe   : > { %p367_p8 = scmp.lt.s32.totalorder %s1467_s24, 3 }
  0x10   : > { %p368_p9 = pnand %p1134_p7, %p367_p8 }
  0x11   : > { %s2138_s1 = sld [smem:[#allocation8_spill]] (!%p368_p9)  ;;  %p412_p10 = scmp.lt.s32.totalorder (!%p368_p9), %s1564_s25, 1  ;;  %v1469_v7 = vmov (!%p368_p9), 0.0   ;;  %v534_v12 = vld [vmem:[%s2119_s3 + $0x80] sm:$0xff] (!%p368_p9)  ;;  %v535_v13 = vld [vmem:[%s2119_s3 + $0x88] sm:$0xff] (!%p368_p9)  ;;  %v536_v19 = vld [vmem:[%s2119_s3 + $0x90] sm:$0xff] (!%p368_p9)  ;;  %v431_v62 = vlaneseq (!%p368_p9) }
  0x12   : > { %371 = sbr.rel (%p368_p9) target bundleno = 1312 (0x520), region = 64  ;;  %509 = vmatprep.mubr.f32.mxu0 (!%p368_p9), %v1469_v7  ;;  %v518_v14 = vld [vmem:[%s2119_s3] sm:$0xff] (!%p368_p9)  ;;  %v519_v15 = vld [vmem:[%s2119_s3 + $0x8] sm:$0xff] (!%p368_p9)  ;;  %v1223_v17 = vpack.c.bf16 (!%p368_p9), %v535_v13, %v534_v12  ;;  %v537_v20 = vld [vmem:[%s2119_s3 + $0x98] sm:$0xff] (!%p368_p9)  ;;  %vm441_vm0 = vcmask (!%p368_p9), 261120   ;;  %s1470_s17 = smov (!%p368_p9), 28  }
  0x13   : > { %v1225_v18 = vpack.c.bf16 (!%p368_p9), %v519_v15, %v518_v14  ;;  %v520_v21 = vld [vmem:[%s2119_s3 + $0x10] sm:$0xff] (!%p368_p9)  ;;  %v1227_v22 = vpack.c.bf16 (!%p368_p9), %v537_v20, %v536_v19  ;;  %v521_v23 = vld [vmem:[%s2119_s3 + $0x18] sm:$0xff] (!%p368_p9)  ;;  %v538_v24 = vld [vmem:[%s2119_s3 + $0xa0] sm:$0xff] (!%p368_p9)  ;;  %v1725_v63 = vshrl.u32 (!%p368_p9), %v431_v62, 7  ;;  %v1471_v19 = vmov (!%p368_p9), 2   ;;  %s1473_s18 = smov (!%p368_p9), 96  }
  0x14   : > { %v539_v25 = vld [vmem:[%s2119_s3 + $0xa8] sm:$0xff] (!%p368_p9)  ;;  %1224 = vmatprep.subr.bf16.mxu1 (!%p368_p9), %v1223_v17  ;;  %v1229_v26 = vpack.c.bf16 (!%p368_p9), %v521_v23, %v520_v21  ;;  %v522_v29 = vld [vmem:[%s2119_s3 + $0x20] sm:$0xff] (!%p368_p9)  ;;  %v540_v31 = vld [vmem:[%s2119_s3 + $0xb0] sm:$0xff] (!%p368_p9)  ;;  %1400 = vset.pattern.permute.xlu0 (!%p368_p9), %v1471_v19  ;;  %v1472_v20 = vmov (!%p368_p9), 0   ;;  %s1476_s27 = smov (!%p368_p9), 8   ;;  %vm1023_vm1 = vcmask (!%p368_p9), 64512  }
  0x15   : > { %1226 = vmatpush3.bf16.msra.mxu1 (!%p368_p9), %v1225_v18  ;;  %v1231_v28 = vpack.c.bf16 (!%p368_p9), %v539_v25, %v538_v24  ;;  %v523_v30 = vld [vmem:[%s2119_s3 + $0x28] sm:$0xff] (!%p368_p9)  ;;  %v541_v32 = vld [vmem:[%s2119_s3 + $0xb8] sm:$0xff] (!%p368_p9)  ;;  %v524_v35 = vld [vmem:[%s2119_s3 + $0x30] sm:$0xff] (!%p368_p9)  ;;  %1398 = vset.pattern.permute.xlu1 (!%p368_p9), %v1472_v20  ;;  %vm1025_vm2 = vcmask (!%p368_p9), 97280   ;;  %s1142_s29 = sshll.u32 (!%p368_p9), %s1564_s25, 7 }
  0x16   : > { %1228 = vmatprep.subr.bf16.mxu1 (!%p368_p9), %v1227_v22  ;;  %v1233_v33 = vpack.c.bf16 (!%p368_p9), %v523_v30, %v522_v29  ;;  %v1235_v34 = vpack.c.bf16 (!%p368_p9), %v541_v32, %v540_v31  ;;  %v525_v36 = vld [vmem:[%s2119_s3 + $0x38] sm:$0xff] (!%p368_p9)  ;;  %v542_v37 = vld [vmem:[%s2119_s3 + $0xc0] sm:$0xff] (!%p368_p9)  ;;  %v543_v38 = vld [vmem:[%s2119_s3 + $0xc8] sm:$0xff] (!%p368_p9) }
  0x17   : > { %v422_v0 = vld [vmem:[%s2138_s1 + $0x8] sm:$0xff] (!%p368_p9)  ;;  %v424_v1 = vld [vmem:[%s2138_s1 + $0x18] sm:$0xff] (!%p368_p9)  ;;  %v421_v2 = vld [vmem:[%s2138_s1] sm:$0xff] (!%p368_p9)  ;;  %v1237_v39 = vpack.c.bf16 (!%p368_p9), %v525_v36, %v524_v35  ;;  %v1239_v40 = vpack.c.bf16 (!%p368_p9), %v543_v38, %v542_v37 }
  0x18   : > { %v1215_v3 = vpack.c.bf16 (!%p368_p9), %v424_v1, %v422_v0  ;;  %v423_v4 = vld [vmem:[%s2138_s1 + $0x10] sm:$0xff] (!%p368_p9)  ;;  %v426_v5 = vld [vmem:[%s2138_s1 + $0x28] sm:$0xff] (!%p368_p9)  ;;  %v428_v6 = vld [vmem:[%s2138_s1 + $0x38] sm:$0xff] (!%p368_p9)  ;;  %v1728_v0 = vsub.s32 (!%p368_p9), 0, %v1725_v63 }
  0x19   : > { %v1217_v8 = vpack.c.bf16 %v423_v4, %v421_v2  ;;  %v1219_v9 = vpack.c.bf16 %v428_v6, %v426_v5  ;;  %v425_v10 = vld [vmem:[%s2138_s1 + $0x20] sm:$0xff]  ;;  %v427_v11 = vld [vmem:[%s2138_s1 + $0x30] sm:$0xff]  ;;  %s1617_s26 = scalar_select %p412_p10, %s1564_s25, 1  ;;  %1230 = vmatpush3.bf16.msra.mxu1 %v1229_v26  ;;  %v527_v42 = vld [vmem:[%s2119_s3 + $0x48] sm:$0xff]  ;;  %v1734_v2 = vsub.s32 1, %v1725_v63 }
  0x1a   : > { %1216 = vmatprep.subr.bf16.mxu0 %v1215_v3  ;;  %v1221_v16 = vpack.c.bf16 %v427_v11, %v425_v10  ;;  %1232 = vmatprep.subr.bf16.mxu1 %v1231_v28  ;;  %v526_v41 = vld [vmem:[%s2119_s3 + $0x40] sm:$0xff]  ;;  %v544_v43 = vld [vmem:[%s2119_s3 + $0xd0] sm:$0xff]  ;;  %v545_v44 = vld [vmem:[%s2119_s3 + $0xd8] sm:$0xff]  ;;  %s1477_s25 = smov [#allocation2]  }
  0x1b   : > { %1218 = vmatpush1.bf16.msra.mxu0 %v1217_v8  ;;  %s1136_s20 = sshll.u32 %s1617_s26, 3  ;;  %v1241_v45 = vpack.c.bf16 %v527_v42, %v526_v41  ;;  %v1243_v46 = vpack.c.bf16 %v545_v44, %v544_v43  ;;  %v528_v47 = vld [vmem:[%s2119_s3 + $0x50] sm:$0xff]  ;;  %v529_v48 = vld [vmem:[%s2119_s3 + $0x58] sm:$0xff]  ;;  %v546_v49 = vld [vmem:[%s2119_s3 + $0xe0] sm:$0xff]  ;;  %s1409_s28 = sshll.u32 %s1477_s25, 4  ;;  %s1410_s28 = int_to_ptr.vmem [resolvable:$false] %s1409_s28 }
  0x1c   : > { %1220 = vmatprep.subr.bf16.mxu0 %v1219_v9  ;;  %s415_s19 = scalar_lea.vmem %s2116_s0, %s1136_s20  ;;  %v547_v50 = vld [vmem:[%s2119_s3 + $0xe8] sm:$0xff]  ;;  %v1245_v51 = vpack.c.bf16 %v529_v48, %v528_v47  ;;  %v530_v53 = vld [vmem:[%s2119_s3 + $0x60] sm:$0xff]  ;;  %v548_v56 = vld [vmem:[%s2119_s3 + $0xf0] sm:$0xff]  ;;  %s419_s30 = scalar_lea.vmem %s2128_s12, %s1136_s20 }
  0x1d   : > { %v1655_v27 = vld [vmem:[%s415_s19] sm:$0xff]  ;;  %1234 = vmatpush3.bf16.msra.mxu1 %v1233_v33  ;;  %v1247_v52 = vpack.c.bf16 %v547_v50, %v546_v49  ;;  %v531_v54 = vld [vmem:[%s2119_s3 + $0x68] sm:$0xff]  ;;  %v549_v57 = vld [vmem:[%s2119_s3 + $0xf8] sm:$0xff]  ;;  %s403_s19 = sand.u32 1, %s1459_s22  }
  0x1e   : > { %1236 = vmatprep.subr.bf16.mxu1 %v1235_v34  ;;  %v1249_v55 = vpack.c.bf16 %v531_v54, %v530_v53  ;;  %v1251_v58 = vpack.c.bf16 %v549_v57, %v548_v56  ;;  %v532_v59 = vld [vmem:[%s2119_s3 + $0x70] sm:$0xff]  ;;  %v533_v60 = vld [vmem:[%s2119_s3 + $0x78] sm:$0xff]  ;;  %v429_v1 = vld [vmem:[%s2118_s2] sm:$0x3]  ;;  %s1135_s26 = sshll.u32 %s403_s19, 3 }
  0x1f   : > { %1222 = vmatpush1.bf16.msra.mxu0 %v1221_v16  ;;  %v1253_v61 = vpack.c.bf16 %v533_v60, %v532_v59  ;;  %v434_v3 = vrot.slane %v429_v1, %v1728_v0  ;;  %v438_v4 = vrot.slane %v429_v1, %v1734_v2  ;;  %v1139_v12 = vld [vmem:[%s2120_s4] ss:$0 sm:$0xff]  ;;  %v762_v23 = vld [vmem:[%s2123_s7 + $0x8] sm:$0xff]  ;;  %v764_v24 = vld [vmem:[%s2123_s7 + $0x18] sm:$0xff]  ;;  %s405_s15 = scalar_lea.vmem [#allocation2], %s1135_s26  ;;  %s1411_s26 = scalar_lea.vmem %s1410_s28, 256 }
  0x20   : > { %v761_v25 = vld [vmem:[%s2123_s7] sm:$0xff]  ;;  %v1255_v26 = vpack.c.bf16 %v764_v24, %v762_v23  ;;  %v763_v28 = vld [vmem:[%s2123_s7 + $0x10] sm:$0xff]  ;;  %v768_v29 = vld [vmem:[%s2123_s7 + $0x38] sm:$0xff]  ;;  %s1045_s23 = sshll.u32 %s405_s15, 4  ;;  %s2075_s23 = int_to_ptr.vmem [resolvable:$true] %s1045_s23 }
  0x21   : > { %1238 = vmatpush3.bf16.msra.mxu1 %v1237_v39  ;;  %v1257_v30 = vpack.c.bf16 %v763_v28, %v761_v25  ;;  %v765_v32 = vld [vmem:[%s2123_s7 + $0x20] sm:$0xff]  ;;  %v767_v33 = vld [vmem:[%s2123_s7 + $0x30] sm:$0xff]  ;;  %v770_v34 = vld [vmem:[%s2123_s7 + $0x48] sm:$0xff]  ;;  %p1412_p0 = scmp.lt.s32.totalorder %s2075_s23, %s1410_s28 }
  0x22   : > { %1138 = vmatmul.mubr.msk.f32.vlgmr.msra.gmra.mrb[0].mxu0 %vm441_vm0, %v1655_v27  ;;  %1240 = vmatprep.subr.bf16.mxu1 %v1239_v40  ;;  %v772_v35 = vld [vmem:[%s2123_s7 + $0x58] sm:$0xff]  ;;  %v1261_v36 = vpack.c.bf16 %v767_v33, %v765_v32  ;;  %v769_v38 = vld [vmem:[%s2123_s7 + $0x40] sm:$0xff]  ;;  %v771_v39 = vld [vmem:[%s2123_s7 + $0x50] sm:$0xff] }
  0x23   : > { %1256 = vmatprep.subr.bf16.mxu0 %v1255_v26  ;;  %v1263_v37 = vpack.c.bf16 %v772_v35, %v770_v34  ;;  %v774_v40 = vld [vmem:[%s2123_s7 + $0x68] sm:$0xff]  ;;  %v776_v41 = vld [vmem:[%s2123_s7 + $0x78] sm:$0xff]  ;;  %v1265_v42 = vpack.c.bf16 %v771_v39, %v769_v38  ;;  %v773_v44 = vld [vmem:[%s2123_s7 + $0x60] sm:$0xff] }
  0x24   : > { %1258 = vmatpush1.bf16.msra.mxu0 %v1257_v30  ;;  %v1267_v43 = vpack.c.bf16 %v776_v41, %v774_v40  ;;  %v780_v47 = vld [vmem:[%s2123_s7 + $0x98] sm:$0xff]  ;;  %v777_v50 = vld [vmem:[%s2123_s7 + $0x80] sm:$0xff]  ;;  %v783_v57 = vld [vmem:[%s2123_s7 + $0xb0] sm:$0xff] }
  0x25   : > { %1242 = vmatpush3.bf16.msra.mxu1 %v1241_v45  ;;  %v775_v45 = vld [vmem:[%s2123_s7 + $0x70] sm:$0xff]  ;;  %v784_v53 = vld [vmem:[%s2123_s7 + $0xb8] sm:$0xff]  ;;  %v781_v56 = vld [vmem:[%s2123_s7 + $0xa0] sm:$0xff] }
  0x26   : > { %1244 = vmatprep.subr.bf16.mxu1 %v1243_v46  ;;  %v778_v46 = vld [vmem:[%s2123_s7 + $0x88] sm:$0xff]  ;;  %v1269_v48 = vpack.c.bf16 %v775_v45, %v773_v44  ;;  %v788_v59 = vld [vmem:[%s2123_s7 + $0xd8] sm:$0xff]  ;;  %v1277_v60 = vpack.c.bf16 %v783_v57, %v781_v56  ;;  %v785_v62 = vld [vmem:[%s2123_s7 + $0xc0] sm:$0xff] }
  0x27   : > { %v1271_v49 = vpack.c.bf16 %v780_v47, %v778_v46  ;;  %v787_v1 = vld [vmem:[%s2123_s7 + $0xd0] sm:$0xff]  ;;  %v797_v20 = vld [vmem:[%s2123_s7 + $0x120] sm:$0xff]  ;;  %v804_v23 = vld [vmem:[%s2123_s7 + $0x158] sm:$0xff] }
  0x28   : > { %v801_v26 = vld [vmem:[%s2123_s7 + $0x140] sm:$0xff]  ;;  %v803_v28 = vld [vmem:[%s2123_s7 + $0x150] sm:$0xff]  ;;  %v812_v38 = vld [vmem:[%s2123_s7 + $0x198] sm:$0xff] }
  0x29   : > { %1246 = vmatpush3.bf16.msra.mxu1 %v1245_v51  ;;  %v779_v51 = vld [vmem:[%s2123_s7 + $0x90] sm:$0xff]  ;;  %v1297_v30 = vpack.c.bf16 %v803_v28, %v801_v26  ;;  %v805_v32 = vld [vmem:[%s2123_s7 + $0x160] sm:$0xff]  ;;  %v816_v44 = vld [vmem:[%s2123_s7 + $0x1b8] sm:$0xff] }
  0x2a   : > { %1248 = vmatprep.subr.bf16.mxu1 %v1247_v52  ;;  %v782_v52 = vld [vmem:[%s2123_s7 + $0xa8] sm:$0xff]  ;;  %v1273_v54 = vpack.c.bf16 %v779_v51, %v777_v50  ;;  %v807_v33 = vld [vmem:[%s2123_s7 + $0x170] sm:$0xff]  ;;  %v809_v40 = vld [vmem:[%s2123_s7 + $0x180] sm:$0xff]  ;;  %v1475_v50 = vmov 3  }
  0x2b   : > { %v1301_v34 = vpack.c.bf16 %v807_v33, %v805_v32  ;;  %v811_v41 = vld [vmem:[%s2123_s7 + $0x190] sm:$0xff]  ;;  %v813_v46 = vld [vmem:[%s2123_s7 + $0x1a0] sm:$0xff]  ;;  %v818_v51 = vld [vmem:[%s2123_s7 + $0x1c8] sm:$0xff] }
  0x2c   : > { %v815_v47 = vld [vmem:[%s2123_s7 + $0x1b0] sm:$0xff]  ;;  %v822_v57 = vld [vmem:[%s2123_s7 + $0x1e8] sm:$0xff]  ;;  %v934_v26 = vld [vmem:[%s2125_s9 + $0xc0] sm:$0xff] }
  0x2d   : > { %1250 = vmatpush3.bf16.msra.mxu1 %v1249_v55  ;;  %v1275_v55 = vpack.c.bf16 %v784_v53, %v782_v52  ;;  %v820_v52 = vld [vmem:[%s2123_s7 + $0x1d8] sm:$0xff]  ;;  %v935_v28 = vld [vmem:[%s2125_s9 + $0xc8] sm:$0xff]  ;;  %v936_v32 = vld [vmem:[%s2125_s9 + $0xd0] sm:$0xff] }
  0x2e   : > { %1252 = vmatprep.subr.bf16.mxu1 %v1251_v58  ;;  %v786_v58 = vld [vmem:[%s2123_s7 + $0xc8] sm:$0xff]  ;;  %v1311_v53 = vpack.c.bf16 %v820_v52, %v818_v51  ;;  %v937_v33 = vld [vmem:[%s2125_s9 + $0xd8] sm:$0xff] }
  0x31   : > { %1254 = vmatpush3.bf16.msra.mxu1 %v1253_v61  ;;  %v1279_v61 = vpack.c.bf16 %v788_v59, %v786_v58  ;;  %v824_v58 = vld [vmem:[%s2123_s7 + $0x1f8] sm:$0xff] }
  0x32   : > { %v1315_v59 = vpack.c.bf16 %v824_v58, %v822_v57 }
  0xf5   : > { %v511_v5 = vpop.f32.mrb[0].mxu0 }
  0xf6   : > { %v512_v6 = vadd.f32 %v511_v5, %v434_v3  ;;  %v513_v7 = vpop.f32.mrb[1].mxu0  ;;  %v790_v3 = vld [vmem:[%s2123_s7 + $0xe8] sm:$0xff]  ;;  %v1281_v5 = vpack.c.bf16 %v787_v1, %v785_v62  ;;  %v926_v1 = vld [vmem:[%s2125_s9 + $0x80] sm:$0xff] }
  0xf7   : > { %v514_v8 = vadd.f32 %v513_v7, %v438_v4  ;;  %v792_v4 = vld [vmem:[%s2123_s7 + $0xf8] sm:$0xff]  ;;  %v789_v7 = vld [vmem:[%s2123_s7 + $0xe0] sm:$0xff] }
  0xf8   : > { %v516_v10 = vmax.f32 %v512_v6, 0.0  ;;  %v1283_v6 = vpack.c.bf16 %v792_v4, %v790_v3  ;;  %v927_v3 = vld [vmem:[%s2125_s9 + $0x88] sm:$0xff]  ;;  %v910_v4 = vld [vmem:[%s2125_s9] sm:$0xff] }
  0xf9   : > { %v517_v9 = vmax.f32 %v514_v8, 0.0  ;;  %v791_v8 = vld [vmem:[%s2123_s7 + $0xf0] sm:$0xff] }
  0xfb   : > { %621 = vmatprep.mubr.f32.mxu1 %v517_v9  ;;  %v794_v9 = vld [vmem:[%s2123_s7 + $0x108] sm:$0xff] }
  0xfc   : > { %622 = vmatmul.mubr.f32.vlgmr.msra.gmra.mrb[0].mxu1 %v516_v10  ;;  %v796_v10 = vld [vmem:[%s2123_s7 + $0x118] sm:$0xff] }
 0x1cf   : > { %v1177_v11 = vpop.f32.mrb[0].mxu1 }
 0x1d0   : > { %v1178_v13 = vpop.f32.mrb[1].mxu1 }
 0x1d1   : > { %v1179_v14 = vadd.f32 %v1178_v13, %v1177_v11  ;;  %v1285_v11 = vpack.c.bf16 %v791_v8, %v789_v7  ;;  %v793_v13 = vld [vmem:[%s2123_s7 + $0x100] sm:$0xff]  ;;  %v928_v7 = vld [vmem:[%s2125_s9 + $0x90] sm:$0xff]  ;;  %v929_v8 = vld [vmem:[%s2125_s9 + $0x98] sm:$0xff] }
 0x1d3   : > { %v1741_v15 = vadd.f32 %v1179_v14, %v1139_v12  ;;  %v1287_v12 = vpack.c.bf16 %v796_v10, %v794_v9  ;;  %v795_v14 = vld [vmem:[%s2123_s7 + $0x110] sm:$0xff]  ;;  %v1323_v10 = vpack.c.bf16 %v929_v8, %v928_v7 }
 0x1d5   : > { %v627_v16 = vmul.f32 0.5, %v1741_v15 }
 0x1d7   : > { %v628_v17 = vmul.f32 1.442695, %v627_v16  ;;  %v798_v16 = vld [vmem:[%s2123_s7 + $0x128] sm:$0xff] }
 0x1d9   : > { %1403 = vpow2.f32 %v628_v17  ;;  %v800_v17 = vld [vmem:[%s2123_s7 + $0x138] sm:$0xff] }
 0x1da   : > { %v1291_v19 = vpack.c.bf16 %v800_v17, %v798_v16 }
 0x1e3   : > { %v1404_v18 = vpop.eup %1403 }
 0x1e4   : > { %631 = vrot.lane.b32.xlu0 %v1404_v18, %s1470_s17  ;;  %v1289_v18 = vpack.c.bf16 %v795_v14, %v793_v13  ;;  %v930_v13 = vld [vmem:[%s2125_s9 + $0xa0] sm:$0xff]  ;;  %v931_v14 = vld [vmem:[%s2125_s9 + $0xa8] sm:$0xff]  ;;  %s2073_s17 = scalar_lea.hbm %s2127_s11, %s1142_s29 }
 0x1e5   : > { %v1327_v17 = vpack.c.bf16 %v931_v14, %v930_v13 }
 0x256   : > { %v632_v21 = vpop.permute.xlu0 %631 }
 0x257   : > { %v634_v22 = vmul.f32 %v632_v21, %v1655_v27  ;;  %v766_v27 = vld [vmem:[%s2123_s7 + $0x28] sm:$0xff]  ;;  %v799_v21 = vld [vmem:[%s2123_s7 + $0x130] sm:$0xff] }
 0x258   : > { %v1259_v31 = vpack.c.bf16 %v768_v29, %v766_v27  ;;  %v1293_v24 = vpack.c.bf16 %v799_v21, %v797_v20  ;;  %v806_v27 = vld [vmem:[%s2123_s7 + $0x168] sm:$0xff]  ;;  %v808_v29 = vld [vmem:[%s2123_s7 + $0x178] sm:$0xff]  ;;  %v932_v20 = vld [vmem:[%s2125_s9 + $0xb0] sm:$0xff] }
 0x259   : > { %636 = vrot.lane.b32.xlu0 %v634_v22, %s1473_s18  ;;  %v802_v22 = vld [vmem:[%s2123_s7 + $0x148] sm:$0xff]  ;;  %v933_v21 = vld [vmem:[%s2125_s9 + $0xb8] sm:$0xff]  ;;  %s1028_s18 = scalar_lea.sflag [#allocation3], %s403_s19 }
 0x25a   : > { %1260 = vmatprep.subr.bf16.mxu0 %v1259_v31  ;;  %v1295_v25 = vpack.c.bf16 %v804_v23, %v802_v22  ;;  %v1299_v31 = vpack.c.bf16 %v808_v29, %v806_v27  ;;  %v1331_v23 = vpack.c.bf16 %v933_v21, %v932_v20  ;;  %v1335_v29 = vpack.c.bf16 %v935_v28, %v934_v26 }
 0x25b   : > { %1262 = vmatpush1.bf16.msra.mxu0 %v1261_v36 }
 0x25c   : > { %1264 = vmatprep.subr.bf16.mxu0 %v1263_v37  ;;  %v810_v37 = vld [vmem:[%s2123_s7 + $0x188] sm:$0xff] }
 0x25d   : > { %v1303_v39 = vpack.c.bf16 %v812_v38, %v810_v37  ;;  %v921_v37 = vld [vmem:[%s2125_s9 + $0x58] sm:$0xff]  ;;  %v938_v38 = vld [vmem:[%s2125_s9 + $0xe0] sm:$0xff] }
 0x25f   : > { %1266 = vmatpush1.bf16.msra.mxu0 %v1265_v42  ;;  %v1305_v42 = vpack.c.bf16 %v811_v41, %v809_v40 }
 0x260   : > { %1268 = vmatprep.subr.bf16.mxu0 %v1267_v43  ;;  %v814_v43 = vld [vmem:[%s2123_s7 + $0x1a8] sm:$0xff] }
 0x261   : > { %v1307_v45 = vpack.c.bf16 %v816_v44, %v814_v43  ;;  %v640_v43 = vld [vmem:[%s2121_s5] sm:$0xff] }
 0x262   : > { %v662_v44 = vrot.slane %v640_v43, %v1728_v0  ;;  %v688_v52 = vrot.slane %v640_v43, %v1734_v2 }
 0x263   : > { %1270 = vmatpush1.bf16.msra.mxu0 %v1269_v48  ;;  %v1474_v48 = vmov 1  }
 0x264   : > { %1272 = vmatprep.subr.bf16.mxu0 %v1271_v49  ;;  %v1309_v49 = vpack.c.bf16 %v815_v47, %v813_v46  ;;  %v691_v46 = vsub.s32 5, %v1725_v63  ;;  %v713_v47 = vsub.s32 2, %v1725_v63 }
 0x267   : > { %1274 = vmatpush1.bf16.msra.mxu0 %v1273_v54  ;;  %v817_v54 = vld [vmem:[%s2123_s7 + $0x1c0] sm:$0xff] }
 0x268   : > { %1276 = vmatprep.subr.bf16.mxu0 %v1275_v55  ;;  %v819_v55 = vld [vmem:[%s2123_s7 + $0x1d0] sm:$0xff] }
 0x269   : > { %v1313_v56 = vpack.c.bf16 %v819_v55, %v817_v54  ;;  %v739_v54 = vsub.s32 3, %v1725_v63  ;;  %v743_v55 = vsub.s32 7, %v1725_v63 }
 0x26b   : > { %1278 = vmatpush1.bf16.msra.mxu0 %v1277_v60  ;;  %v821_v60 = vld [vmem:[%s2123_s7 + $0x1e0] sm:$0xff] }
 0x26c   : > { %1280 = vmatprep.subr.bf16.mxu0 %v1279_v61  ;;  %v823_v61 = vld [vmem:[%s2123_s7 + $0x1f0] sm:$0xff] }
 0x26d   : > { %v1317_v62 = vpack.c.bf16 %v823_v61, %v821_v60 }
 0x26f   : > { %1282 = vmatpush1.bf16.msra.mxu0 %v1281_v5  ;;  %v1319_v5 = vpack.c.bf16 %v927_v3, %v926_v1  ;;  %v698_v1 = vrot.slane %v688_v52, %v1734_v2 }
 0x270   : > { %1284 = vmatprep.subr.bf16.mxu0 %v1283_v6  ;;  %v911_v6 = vld [vmem:[%s2125_s9 + $0x8] sm:$0xff] }
 0x271   : > { %v1321_v9 = vpack.c.bf16 %v911_v6, %v910_v4  ;;  %1320 = vmatprep.subr.bf16.mxu1 %v1319_v5  ;;  %v740_v4 = vrot.slane %v640_v43, %v739_v54  ;;  %v744_v5 = vrot.slane %v640_v43, %v743_v55 }
 0x273   : > { %1286 = vmatpush1.bf16.msra.mxu0 %v1285_v11  ;;  %v912_v11 = vld [vmem:[%s2125_s9 + $0x10] sm:$0xff]  ;;  %1322 = vmatpush3.bf16.msra.mxu1 %v1321_v9  ;;  %v750_v13 = vrot.slane %v740_v4, %v739_v54  ;;  %v754_v14 = vrot.slane %v744_v5, %v739_v54 }
 0x274   : > { %1288 = vmatprep.subr.bf16.mxu0 %v1287_v12  ;;  %v913_v12 = vld [vmem:[%s2125_s9 + $0x18] sm:$0xff]  ;;  %1324 = vmatprep.subr.bf16.mxu1 %v1323_v10 }
 0x275   : > { %v1325_v16 = vpack.c.bf16 %v913_v12, %v912_v11 }
 0x277   : > { %1290 = vmatpush1.bf16.msra.mxu0 %v1289_v18  ;;  %v914_v18 = vld [vmem:[%s2125_s9 + $0x20] sm:$0xff]  ;;  %1326 = vmatpush3.bf16.msra.mxu1 %v1325_v16 }
 0x278   : > { %1292 = vmatprep.subr.bf16.mxu0 %v1291_v19  ;;  %v915_v19 = vld [vmem:[%s2125_s9 + $0x28] sm:$0xff]  ;;  %1328 = vmatprep.subr.bf16.mxu1 %v1327_v17 }
 0x279   : > { %v1329_v22 = vpack.c.bf16 %v915_v19, %v914_v18 }
 0x27b   : > { %1294 = vmatpush1.bf16.msra.mxu0 %v1293_v24  ;;  %v916_v24 = vld [vmem:[%s2125_s9 + $0x30] sm:$0xff]  ;;  %1330 = vmatpush3.bf16.msra.mxu1 %v1329_v22 }
 0x27c   : > { %1296 = vmatprep.subr.bf16.mxu0 %v1295_v25  ;;  %v917_v25 = vld [vmem:[%s2125_s9 + $0x38] sm:$0xff]  ;;  %1332 = vmatprep.subr.bf16.mxu1 %v1331_v23 }
 0x27d   : > { %v1333_v27 = vpack.c.bf16 %v917_v25, %v916_v24 }
 0x27f   : > { %1298 = vmatpush1.bf16.msra.mxu0 %v1297_v30  ;;  %v918_v30 = vld [vmem:[%s2125_s9 + $0x40] sm:$0xff]  ;;  %1334 = vmatpush3.bf16.msra.mxu1 %v1333_v27 }
 0x280   : > { %1300 = vmatprep.subr.bf16.mxu0 %v1299_v31  ;;  %v919_v31 = vld [vmem:[%s2125_s9 + $0x48] sm:$0xff]  ;;  %1336 = vmatprep.subr.bf16.mxu1 %v1335_v29 }
 0x283   : > { %1302 = vmatpush1.bf16.msra.mxu0 %v1301_v34  ;;  %v1337_v34 = vpack.c.bf16 %v919_v31, %v918_v30  ;;  %v922_v31 = vld [vmem:[%s2125_s9 + $0x60] sm:$0xff] }
 0x284   : > { %1304 = vmatprep.subr.bf16.mxu0 %v1303_v39  ;;  %v939_v39 = vld [vmem:[%s2125_s9 + $0xe8] sm:$0xff] }
 0x285   : > { %1338 = vmatpush3.bf16.msra.mxu1 %v1337_v34  ;;  %v1343_v41 = vpack.c.bf16 %v939_v39, %v938_v38  ;;  %v940_v34 = vld [vmem:[%s2125_s9 + $0xf0] sm:$0xff]  ;;  %v825_v39 = vld [vmem:[%s2124_s8] sm:$0x3] }
 0x287   : > { %1306 = vmatpush1.bf16.msra.mxu0 %v1305_v42  ;;  %v665_v42 = vsub.s32 4, %v1725_v63 }
 0x288   : > { %1308 = vmatprep.subr.bf16.mxu0 %v1307_v45 }
 0x289   : > { %v666_v45 = vrot.slane %v640_v43, %v665_v42 }
 0x28b   : > { %1310 = vmatpush1.bf16.msra.mxu0 %v1309_v49  ;;  %v641_v49 = vld [vmem:[%s2122_s6] sm:$0x3]  ;;  %v676_v51 = vrot.slane %v666_v45, %v1728_v0 }
 0x28c   : > { %1312 = vmatprep.subr.bf16.mxu0 %v1311_v53  ;;  %v692_v53 = vrot.slane %v640_v43, %v691_v46  ;;  %v650_v60 = vrot.slane %v641_v49, %v1734_v2 }
 0x28e   : > { %v702_v3 = vrot.slane %v692_v53, %v1734_v2 }
 0x28f   : > { %1314 = vmatpush1.bf16.msra.mxu0 %v1313_v56  ;;  %v714_v56 = vrot.slane %v640_v43, %v713_v47 }
 0x290   : > { %1316 = vmatprep.subr.bf16.mxu0 %v1315_v59  ;;  %v646_v59 = vrot.slane %v641_v49, %v1728_v0  ;;  %v1140_v49 = vld [vmem:[%s2126_s10] ss:$0 sm:$0xff] }
 0x291   : > { %v724_v6 = vrot.slane %v714_v56, %v713_v47 }
 0x293   : > { %1318 = vmatpush1.bf16.msra.mxu0 %v1317_v62 }
 0x2cb   : > { %v637_v35 = vpop.permute.xlu0 %636 }
 0x2cc   : > { %v639_v36 = vadd.f32 %v637_v35, %v1741_v15  ;;  %v1339_v35 = vpack.c.bf16 %v937_v33, %v936_v32  ;;  %v923_v32 = vld [vmem:[%s2125_s9 + $0x68] sm:$0xff] }
 0x2cd   : > { %v1345_v33 = vpack.c.bf16 %v923_v32, %v922_v31 }
 0x2ce   : > { %708 = vperm.xlu0 %1400, %v639_v36   ;;  %655 = vperm.xlu1 %1398, %v639_v36  }
 0x2cf   : > { %1340 = vmatprep.subr.bf16.mxu1 %v1339_v35 }
 0x2d2   : > { %1399 = vset.pattern.permute.xlu1 %v1474_v48  ;;  %1402 = vset.pattern.permute.xlu0 %v1475_v50  ;;  %v717_v48 = vsub.s32 6, %v1725_v63 }
 0x2d3   : > { %682 = vperm.xlu1 %1399, %v639_v36  }
 0x2d4   : > { %v718_v57 = vrot.slane %v640_v43, %v717_v48 }
 0x2d6   : > { %v728_v7 = vrot.slane %v718_v57, %v713_v47 }
 0x2d7   : > { %1401 = vset.pattern.permute.xlu1 %v1475_v50  ;;  %v672_v50 = vrot.slane %v662_v44, %v1728_v0 }
 0x2d8   : > { %734 = vperm.xlu1 %1401, %v639_v36  }
 0x2dc   : > { %1020 = vrot.lane.b32.xlu1 %v639_v36, %s1476_s27  ;;  %v920_v36 = vld [vmem:[%s2125_s9 + $0x50] sm:$0xff] }
 0x2dd   : > { %v1341_v40 = vpack.c.bf16 %v921_v37, %v920_v36  ;;  %v924_v36 = vld [vmem:[%s2125_s9 + $0x70] sm:$0xff]  ;;  %v925_v37 = vld [vmem:[%s2125_s9 + $0x78] sm:$0xff] }
 0x2de   : > { %v1349_v38 = vpack.c.bf16 %v925_v37, %v924_v36 }
 0x2df   : > { %1342 = vmatpush3.bf16.msra.mxu1 %v1341_v40  ;;  %v830_v40 = vrot.slane %v825_v39, %v1728_v0 }
 0x2e0   : > { %1344 = vmatprep.subr.bf16.mxu1 %v1343_v41  ;;  %v834_v41 = vrot.slane %v825_v39, %v1734_v2 }
 0x2e3   : > { %1346 = vmatpush3.bf16.msra.mxu1 %v1345_v33 }
 0x34d   : > { %v656_v58 = vpop.permute.xlu1 %655  ;;  %v709_v8 = vpop.permute.xlu0 %708 }
 0x34e   : > { %v677_v61 = vmul.f32 %v672_v50, %v656_v58  ;;  %v678_v62 = vmul.f32 %v676_v51, %v656_v58  ;;  %v729_v16 = vmul.f32 %v724_v6, %v709_v8  ;;  %v730_v17 = vmul.f32 %v728_v7, %v709_v8 }
 0x350   : > { %v679_v63 = vadd.f32 %v677_v61, %v646_v59  ;;  %v680_v10 = vadd.f32 %v678_v62, %v650_v60 }
 0x352   : > { %v683_v9 = vpop.permute.xlu1 %682 }
 0x353   : > { %v703_v11 = vmul.f32 %v698_v1, %v683_v9  ;;  %v704_v12 = vmul.f32 %v702_v3, %v683_v9 }
 0x355   : > { %v705_v18 = vadd.f32 %v703_v11, %v679_v63  ;;  %v706_v19 = vadd.f32 %v704_v12, %v680_v10 }
 0x357   : > { %v731_v20 = vadd.f32 %v729_v16, %v705_v18  ;;  %v732_v21 = vadd.f32 %v730_v17, %v706_v19  ;;  %v735_v22 = vpop.permute.xlu1 %734 }
 0x358   : > { %v755_v23 = vmul.f32 %v750_v13, %v735_v22  ;;  %v756_v24 = vmul.f32 %v754_v14, %v735_v22 }
 0x35a   : > { %v757_v25 = vadd.f32 %v755_v23, %v731_v20  ;;  %v758_v26 = vadd.f32 %v756_v24, %v732_v21 }
 0x35b   : > { %v1021_v28 = vpop.permute.xlu1 %1020 }
 0x35c   : > { %v759_v27 = vmax.f32 %v757_v25, 0.0  ;;  %v1024_v29 = vsel %vm1023_vm1, %v1741_v15, %v1021_v28  ;;  %v760_v30 = vmax.f32 %v758_v26, 0.0  ;;  %v941_v15 = vld [vmem:[%s2125_s9 + $0xf8] sm:$0xff] }
 0x35d   : > { %1026 = vst.msk [vmem:[%s419_s30] sm:$0xff] %vm1025_vm2, %v1024_v29  ;;  %v1347_v35 = vpack.c.bf16 %v941_v15, %v940_v34  ;;  %s1405_s30 = scalar_lea.vmem %s2075_s23, 128 }
 0x35e   : > { %901 = vmatprep.mubr.f32.mxu0 %v760_v30  ;;  %p1406_p11 = scmp.ne.s32.totalorder %s2075_s23, %s1405_s30  ;;  %p1413_p1 = scmp.lt.s32.totalorder %s1411_s26, %s1405_s30 }
 0x35f   : > { %902 = vmatmul.mubr.f32.vlgmr.msra.gmra.mrb[2].mxu0 %v759_v27  ;;  %1348 = vmatprep.subr.bf16.mxu1 %v1347_v35 }
 0x360   : > { %1350 = vmatpush3.bf16.msra.mxu1 %v1349_v38  ;;  %p1407_p12 = pnand %p1406_p11, %p1581_p5  ;;  %p1414_p2 = por %p1413_p1, %p1412_p0 }
 0x362   : > { %p1408_p13 = pneg %p1407_p12 }
 0x364   : > { %p1415_p3 = pnand %p1414_p2, %p1408_p13 }
 0x432   : > { %v903_v42 = vpop.f32.mrb[2].mxu0 }
 0x433   : > { %v904_v43 = vadd.f32 %v903_v42, %v830_v40  ;;  %v905_v44 = vpop.f32.mrb[3].mxu0 }
 0x434   : > { %v906_v45 = vadd.f32 %v905_v44, %v834_v41 }
 0x435   : > { %v908_v47 = vmax.f32 %v904_v43, 0.0 }
 0x436   : > { %v909_v46 = vmax.f32 %v906_v45, 0.0 }
 0x438   : > { %1013 = vmatprep.mubr.f32.mxu1 %v909_v46 }
 0x439   : > { %1014 = vmatmul.mubr.f32.vlgmr.msra.gmra.mrb[2].mxu1 %v908_v47 }
 0x50c   : > { %v1212_v48 = vpop.f32.mrb[2].mxu1 }
 0x50d   : > { %v1213_v50 = vpop.f32.mrb[3].mxu1 }
 0x50e   : > { %v1214_v0 = vadd.f32 %v1213_v50, %v1212_v48 }
 0x510   : > { %v1016_v2 = vadd.f32 %v1214_v0, %v1140_v49 }
 0x512   : > { %1019 = vst.msk [vmem:[%s405_s15] sm:$0xff] %vm441_vm0, %v1016_v2 }
 0x513   : > { %1418 = shalt.err (!%p1415_p3)
}
 0x514   : > { %s1419_s19 = scalar_lea.hbm %s2073_s17, 128  ;;  %s1423_s29 = scalar_lea.hbm %s2127_s11, 256 }
 0x515   : > { %p1420_p4 = scmp.ne.s32.totalorder %s2073_s17, %s1419_s19  ;;  %p1424_p9 = scmp.lt.u32.totalorder %s2073_s17, %s2127_s11 }
 0x516   : > { %p1425_p10 = scmp.lt.u32.totalorder %s1423_s29, %s1419_s19  ;;  %p1427_p12 = scmp.lt.u32.totalorder %s1419_s19, %s2073_s17 }
 0x517   : > { %p1421_p7 = pnand %p1420_p4, %p1581_p5 }
 0x518   : > { %p1426_p11 = por %p1425_p10, %p1424_p9 }
 0x519   : > { %p1422_p8 = pneg %p1421_p7 }
 0x51a   : > { %p1428_p13 = por %p1427_p12, %p1426_p11 }
 0x51c   : > { %p1429_p0 = pnand %p1428_p13, %p1422_p8 }
 0x51e   : > { %1432 = shalt.err (!%p1429_p0)
}
 0x51f   : > { %1351 = dma.vmem_to_hbm [thread:$0]  (%p1581_p5), %s2075_s23, 128, %s2073_s17, %s1028_s18  }
 0x520 PF: > { %p1357_p1 = scmp.ge.s32.totalorder %s1467_s24, 2  ;;  %s1060_s16 = sand.u32 1, %s1455_s21  }
 0x521   : > { %s1061_s30 = scalar_lea.sflag [#allocation3], %s1060_s16 }
 0x522   : > { %p1354_p2 = pnand %p1357_p1, %p1585_p6 }
 0x524   : > { %1450 = dma.done.wait (!%p1354_p2), %s1061_s30, 128  }
 0x525   : > { %1452 = vsyncadd (!%p1354_p2), %s1061_s30, 4294967168  ;;  %s2139_s24 = sld [smem:[#allocation6_spill]]  ;;  %s2140_s25 = sld [smem:[#allocation5_spill]] }
 0x526   : > { %s2141_s23 = sld [smem:[#allocation7_spill]]  ;;  %s2142_s21 = smov %s1459_s22 }
 0x52b   : > { %p23_p3 = scmp.ge.s32.totalorder %s2139_s24, 4   ;;  %s2143_s22 = smov %s2140_s25 }
 0x52d   :  { %25 = sbr.rel (!%p23_p3) target bundleno = 5 (0x5), region = 111 }
 0x534   :  { %1073 = vsyncpa [#allocation3], 1 }
 0x535   :  { %1075 = vsyncpa [#allocation3 + $0x1], 1 }

</bundles_post_ra>
